<compile_context>
chip_gen: v6e
topology: v6e:2x2x1
jax: 0.10.0
libtpu: 0.0.40
codegen_flags: <defaults>
</compile_context>

<pallas_src>
import math

import jax
import jax.numpy as jnp
from jax.experimental import pallas as pl
from jax.experimental.pallas import tpu as pltpu


def mlp_kernel(x_ref, w2_ref, vecs_ref, o_ref):
    # x_ref:    [2, tb]   feature-major input tile (batch on lanes)
    # w2_ref:   [32, 32]  layer-2 weight (out, in), VMEM resident
    # vecs_ref: [32, 8]   packed columns: W1[:,0], W1[:,1], b1, b2, W3[0,:], b3, 0, 0
    # o_ref:    [1, tb]   output tile
    w1c0 = vecs_ref[:, 0:1]      # [32, 1]
    w1c1 = vecs_ref[:, 1:2]      # [32, 1]
    b1 = vecs_ref[:, 2:3]        # [32, 1]
    b2 = vecs_ref[:, 3:4]        # [32, 1]
    w3 = vecs_ref[:, 4:5]        # [32, 1]
    b3 = vecs_ref[0:1, 5:6]      # [1, 1]

    x0 = x_ref[0:1, :]           # [1, tb]
    x1 = x_ref[1:2, :]           # [1, tb]

    # Layer 1: Linear(2 -> 32) + Tanh.  K=2 -> VPU broadcast-MACs, no MXU.
    h = jnp.tanh(w1c0 * x0 + w1c1 * x1 + b1)                       # [32, tb]

    # Layer 2: Linear(32 -> 32) + Tanh.  32x32 matmul on the MXU.
    h = jnp.dot(w2_ref[...], h, preferred_element_type=jnp.float32)
    h = jnp.tanh(h + b2)                                            # [32, tb]

    # Layer 3: Linear(32 -> 1) + Identity.  N=1 -> multiply + sublane reduce.
    o_ref[...] = jnp.sum(w3 * h, axis=0, keepdims=True) + b3        # [1, tb]


def pack_params(params):
    """Pack PyTorch-native params ([out,in] weights, [out] biases) for the kernel.

    Specific to layer_sizes = [2, 32, 32, 1].
    Returns (w2 [32,32], vecs [32,8]).
    """
    (w1, b1), (w2, b2), (w3, b3) = params
    d_in = w1.shape[1]
    hidden = w2.shape[0]
    assert d_in == 2 and w1.shape[0] == hidden and w3.shape == (1, hidden)
    vecs = jnp.zeros((hidden, 8), jnp.float32)
    vecs = vecs.at[:, 0].set(w1[:, 0])
    vecs = vecs.at[:, 1].set(w1[:, 1])
    vecs = vecs.at[:, 2].set(b1)
    vecs = vecs.at[:, 3].set(b2)
    vecs = vecs.at[:, 4].set(w3[0, :])
    vecs = vecs.at[0, 5].set(b3[0])
    return w2.astype(jnp.float32), vecs


def mlp_forward(x, params, *, tb=256):
    """x: [B, 2] float32.  params: list of (W [out,in], b [out]) PyTorch-style."""
    w2, vecs = pack_params(params)
    B, d_in = x.shape
    hidden = w2.shape[0]

    # Pad batch up to a multiple of the lane-axis tile and go feature-major.
    b_pad = pl.cdiv(B, tb) * tb
    x_t = jnp.zeros((d_in, b_pad), jnp.float32).at[:, :B].set(x.T)

    out_t = pl.pallas_call(
        mlp_kernel,
        out_shape=jax.ShapeDtypeStruct((1, b_pad), jnp.float32),
        grid=(b_pad // tb,),
        in_specs=[
            pl.BlockSpec((d_in, tb), lambda i: (0, i)),   # batch-tiled input
            pl.BlockSpec((hidden, hidden), lambda i: (0, 0)),  # resident W2
            pl.BlockSpec((hidden, 8), lambda i: (0, 0)),       # resident vec slab
        ],
        out_specs=pl.BlockSpec((1, tb), lambda i: (0, i)),
        compiler_params=pltpu.CompilerParams(
            dimension_semantics=("parallel",)),
    )(x_t, w2, vecs)

    # Back to the module's [B, 1] layout (wrapper-side layout plumbing only).
    return out_t[:, :B].T


def init_params(key, layer_sizes):
    """PyTorch nn.Linear-style init: U(-1/sqrt(fan_in), 1/sqrt(fan_in)).

    Weights kept PyTorch-native [out, in]; biases [out].
    """
    params = []
    for i in range(len(layer_sizes) - 1):
        fan_in, fan_out = layer_sizes[i], layer_sizes[i + 1]
        key, kw, kb = jax.random.split(key, 3)
        bound = 1.0 / math.sqrt(fan_in)
        w = jax.random.uniform(kw, (fan_out, fan_in), jnp.float32,
                               minval=-bound, maxval=bound)
        b = jax.random.uniform(kb, (fan_out,), jnp.float32,
                               minval=-bound, maxval=bound)
        params.append((w, b))
    return params


def mlp_reference(x, params):
    h = x
    n = len(params)
    for i, (w, b) in enumerate(params):
        h = h @ w.T + b
        if i < n - 1:
            h = jnp.tanh(h)   # hidden activation (nn.Tanh)
        # else: output activation is nn.Identity
    return h


if __name__ == "__main__":
    layer_sizes = [2, 32, 32, 1]   # [obs_dim, hidden, hidden, act_dim]
    B = 1000                       # rollout-sized batch; pads to 1024 -> grid of 4

    key = jax.random.PRNGKey(0)
    key, kx = jax.random.split(key)
    x = jax.random.normal(kx, (B, layer_sizes[0]), jnp.float32)

    params = init_params(jax.random.PRNGKey(0), layer_sizes)

    out = mlp_forward(x, params)
    out = jax.block_until_ready(out)

    ref = mlp_reference(x, params)
    assert out.shape == (B, layer_sizes[-1])
    assert jnp.allclose(out, ref, atol=1e-4, rtol=1e-5), "mismatch vs reference"

    print("KERNEL_OK")
</pallas_src>

<mosaic_0001>
module attributes {stable_mosaic.version = 11 : i64} {
  func.func @mlp_kernel(%arg0: i32, %arg1: memref<2x256xf32, #tpu.memory_space<vmem>>, %arg2: memref<32x32xf32, #tpu.memory_space<vmem>>, %arg3: memref<32x8xf32, #tpu.memory_space<vmem>>, %arg4: memref<1x256xf32, #tpu.memory_space<vmem>>) attributes {dimension_semantics = [#tpu.dimension_semantics<parallel>], iteration_bounds = array<i64: 4>, scalar_prefetch = 0 : i64, scratch_operands = 0 : i64, tpu.core_type = #tpu.core_type<tc>, window_params = [{transform_indices = @transform_0, window_bounds = array<i64: 2, 256>}, {pipeline_mode = #tpu.pipeline_mode<synchronous>, transform_indices = @transform_1, window_bounds = array<i64: 32, 32>}, {pipeline_mode = #tpu.pipeline_mode<synchronous>, transform_indices = @transform_2, window_bounds = array<i64: 32, 8>}, {transform_indices = @transform_3, window_bounds = array<i64: 1, 256>}]} {
    %c0 = arith.constant 0 : index
    %c0_0 = arith.constant 0 : index
    %0 = vector.load %arg3[%c0, %c0_0] : memref<32x8xf32, #tpu.memory_space<vmem>>, vector<32x1xf32>
    %c0_1 = arith.constant 0 : index
    %c1 = arith.constant 1 : index
    %1 = vector.load %arg3[%c0_1, %c1] : memref<32x8xf32, #tpu.memory_space<vmem>>, vector<32x1xf32>
    %c0_2 = arith.constant 0 : index
    %c2 = arith.constant 2 : index
    %2 = vector.load %arg3[%c0_2, %c2] : memref<32x8xf32, #tpu.memory_space<vmem>>, vector<32x1xf32>
    %c0_3 = arith.constant 0 : index
    %c3 = arith.constant 3 : index
    %3 = vector.load %arg3[%c0_3, %c3] : memref<32x8xf32, #tpu.memory_space<vmem>>, vector<32x1xf32>
    %c0_4 = arith.constant 0 : index
    %c4 = arith.constant 4 : index
    %4 = vector.load %arg3[%c0_4, %c4] : memref<32x8xf32, #tpu.memory_space<vmem>>, vector<32x1xf32>
    %c0_5 = arith.constant 0 : index
    %c5 = arith.constant 5 : index
    %5 = vector.load %arg3[%c0_5, %c5] : memref<32x8xf32, #tpu.memory_space<vmem>>, vector<1x1xf32>
    %c0_6 = arith.constant 0 : index
    %c0_7 = arith.constant 0 : index
    %6 = vector.load %arg1[%c0_6, %c0_7] : memref<2x256xf32, #tpu.memory_space<vmem>>, vector<1x256xf32>
    %c1_8 = arith.constant 1 : index
    %c0_9 = arith.constant 0 : index
    %7 = vector.load %arg1[%c1_8, %c0_9] : memref<2x256xf32, #tpu.memory_space<vmem>>, vector<1x256xf32>
    %8 = vector.broadcast %0 : vector<32x1xf32> to vector<32x256xf32>
    %9 = vector.broadcast %6 : vector<1x256xf32> to vector<32x256xf32>
    %10 = arith.mulf %8, %9 : vector<32x256xf32>
    %11 = vector.broadcast %1 : vector<32x1xf32> to vector<32x256xf32>
    %12 = vector.broadcast %7 : vector<1x256xf32> to vector<32x256xf32>
    %13 = arith.mulf %11, %12 : vector<32x256xf32>
    %14 = arith.addf %10, %13 : vector<32x256xf32>
    %15 = vector.broadcast %2 : vector<32x1xf32> to vector<32x256xf32>
    %16 = arith.addf %14, %15 : vector<32x256xf32>
    %17 = math.tanh %16 : vector<32x256xf32>
    %c0_10 = arith.constant 0 : index
    %c0_11 = arith.constant 0 : index
    %18 = vector.load %arg2[%c0_10, %c0_11] : memref<32x32xf32, #tpu.memory_space<vmem>>, vector<32x32xf32>
    %cst = arith.constant dense<0.000000e+00> : vector<32x256xf32>
    %19 = tpu.matmul %18, %17, %cst {dimension_numbers = #tpu.dot_dimension_numbers<[1], [0], [0], [1], [0, 0, 1, 1], [], []>} : vector<32x32xf32>, vector<32x256xf32>, vector<32x256xf32> -> vector<32x256xf32>
    %20 = vector.broadcast %3 : vector<32x1xf32> to vector<32x256xf32>
    %21 = arith.addf %19, %20 : vector<32x256xf32>
    %22 = math.tanh %21 : vector<32x256xf32>
    %23 = vector.broadcast %4 : vector<32x1xf32> to vector<32x256xf32>
    %24 = arith.mulf %23, %22 : vector<32x256xf32>
    %cst_12 = arith.constant dense<0.000000e+00> : vector<256xf32>
    %25 = vector.multi_reduction <add>, %24, %cst_12 [0] : vector<32x256xf32> to vector<256xf32>
    %26 = vector.shape_cast %25 : vector<256xf32> to vector<1x256xf32>
    %27 = vector.broadcast %5 : vector<1x1xf32> to vector<1x256xf32>
    %28 = arith.addf %26, %27 : vector<1x256xf32>
    %c0_13 = arith.constant 0 : index
    %c0_14 = arith.constant 0 : index
    %29 = vector.load %arg4[%c0_13, %c0_14] : memref<1x256xf32, #tpu.memory_space<vmem>>, vector<1x256xf32>
    tpu.vector_store %arg4[%c0_13, %c0_14], %28 {strides = array<i32>} : memref<1x256xf32, #tpu.memory_space<vmem>>, vector<1x256xf32>,
    return
  }
  func.func @transform_0(%arg0: i32) -> (i32, i32) {
    %c0_i32 = arith.constant 0 : i32
    %c0_i32_0 = arith.constant 0 : i32
    return %c0_i32, %arg0 : i32, i32
  }
  func.func @transform_1(%arg0: i32) -> (i32, i32) {
    %c0_i32 = arith.constant 0 : i32
    %c0_i32_0 = arith.constant 0 : i32
    %c0_i32_1 = arith.constant 0 : i32
    return %c0_i32, %c0_i32_0 : i32, i32
  }
  func.func @transform_2(%arg0: i32) -> (i32, i32) {
    %c0_i32 = arith.constant 0 : i32
    %c0_i32_0 = arith.constant 0 : i32
    %c0_i32_1 = arith.constant 0 : i32
    return %c0_i32, %c0_i32_0 : i32, i32
  }
  func.func @transform_3(%arg0: i32) -> (i32, i32) {
    %c0_i32 = arith.constant 0 : i32
    %c0_i32_0 = arith.constant 0 : i32
    return %c0_i32, %arg0 : i32, i32
  }
}

</mosaic_0001>

<bundles_post_ra>
// kernel: tpu_custom_call.1
= control target key start
LH: loop header
LB: loop body
LE: loop exit
PB: predicated region body
PF: predicated region fallthrough
CT: control target
= control target key end

     0   :  { %8 = vsyncpa [#allocation3], 0  ;;  %s1034_s0 = inlined_call_operand.hbm [shape: f32[2,1024], index: 0, kind: input, shape index: {}]   ;;  %s1035_s1 = inlined_call_operand.vmem [shape: f32[32,32], index: 1, kind: input, shape index: {}]   ;;  %s1036_s2 = inlined_call_operand.vmem [shape: f32[32,8], index: 2, kind: input, shape index: {}]   ;;  %s1037_s3 = inlined_call_operand.hbm [shape: f32[1,1024], index: 3, kind: output, shape index: {}]  }
   0x1   :  { %10 = vsyncpa [#allocation3 + $0x1], 0 }
   0x2   :  { %11 = vsyncpa [#allocation4], 0 }
   0x3   :  { %13 = vsyncpa [#allocation4 + $0x1], 0  ;;  %s852_s12 = smov 0   ;;  %s854_s13 = smov 0  }
   0x4   :  { %s856_s14 = smov 0   ;;  %s858_s15 = smov 0  }
   0x5 LB: > { %s873_s16 = sadd.s32 4294967295, %s820_s15   ;;  %s598_s17 = sadd.s32 4294967294, %s820_s15   ;;  %s820_s15 = sphi %s858_s15, %s1053_s15   ;;  %s816_s14 = sphi %s856_s14, %s1052_s14   ;;  %s812_s13 = sphi %s854_s13, %s1051_s13   ;;  %s808_s12 = sphi %s852_s12, %s1050_s12  }
   0x6   : > { %s877_s18 = sadd.s32 1, %s820_s15   ;;  %s26_s19 = sadd.s32 1, %s816_s14 }
   0x7   : > { %s23_s20 = ssub.s32 %s820_s15, %s877_s18  ;;  %p33_p0 = scmp.ne.s32.totalorder %s816_s14, %s812_s13 }
   0x8   : > { %p24_p1 = scmp.eq.s32.totalorder %s23_s20, 0  ;;  %p34_p2 = scmp.eq.s32.totalorder %s820_s15, 0 }
   0x9   : > { %p39_p3 = scmp.ne.s32.totalorder %s812_s13, %s808_s12  ;;  %p40_p4 = scmp.eq.s32.totalorder %s873_s16, 0 }
   0xa   : > { %s889_s21 = scalar_select %p24_p1, %s816_s14, %s26_s19  }
   0xb   : > { %p891_p5 = por %p34_p2, %p33_p0  ;;  %p895_p6 = por %p40_p4, %p39_p3 }
   0xc   : > { %p105_p7 = scmp.eq.s32.totalorder %s873_s16, 3  ;;  %p111_p8 = scmp.eq.s32.totalorder %s598_s17, 3 }
   0xd   : > { %s1041_s23 = scalar_select %p895_p6, 1, 0 }
   0xe   : > { %p639_p9 = scmp.lt.s32.totalorder %s820_s15, 4  ;;  %p901_p10 = por %p105_p7, %p33_p0 }
   0xf   : > { %p905_p11 = por %p111_p8, %p39_p3  ;;  %s137_s26 = sand.u32 1, %s816_s14  }
  0x10   : > { %s1042_s24 = scalar_select %p901_p10, 1, 0 }
  0x11   : > { %s1043_s25 = scalar_select %p905_p11, 1, 0 }
  0x12   : > { %s617_s27 = sshll.u32 %s820_s15, 6  ;;  %s601_s28 = sshll.u32 %s137_s26, 2 }
  0x13   : > { %s914_s4 = scalar_lea.hbm %s1034_s0, %s617_s27  ;;  %s141_s5 = scalar_lea.vmem [#allocation2], %s601_s28 }
  0x14   : > { %s149_s6 = sshll.u32 %s141_s5, 4  ;;  %p918_p12 = pnand %p639_p9, %p891_p5  ;;  %s922_s6 = int_to_ptr.vmem [resolvable:$true] %s149_s6 }
  0x15   : > { %s138_s8 = scalar_lea.sflag [#allocation3], %s137_s26  ;;  %s728_s9 = scalar_lea.hbm %s914_s4, 64 }
  0x16   : > { %p729_p1 = scmp.ne.s32.totalorder %s914_s4, %s728_s9  ;;  %p730_p2 = pneg %p918_p12 }
  0x17   : > { %s733_s17 = scalar_lea.hbm %s1034_s0, 256  ;;  %p734_p5 = scmp.lt.s32.totalorder %s914_s4, %s1034_s0 }
  0x18   : > { %p731_p3 = pnand %p730_p2, %p729_p1  ;;  %p735_p7 = scmp.lt.s32.totalorder %s733_s17, %s728_s9 }
  0x1a   : > { %p732_p4 = pneg %p731_p3  ;;  %p736_p8 = por %p735_p7, %p734_p5 }
  0x1c   : > { %p737_p9 = pnand %p736_p8, %p732_p4 }
  0x1e   : > { %740 = shalt.err (!%p737_p9)
}
  0x1f   : > { %s741_s22 = scalar_lea.vmem %s922_s6, 64  ;;  %s822_s26 = smov [#allocation2]  }
  0x20   : > { %p742_p13 = scmp.ne.s32.totalorder %s922_s6, %s741_s22  ;;  %s746_s27 = sshll.u32 %s822_s26, 4  ;;  %s747_s27 = int_to_ptr.vmem [resolvable:$false] %s746_s27 }
  0x21   : > { %s748_s28 = scalar_lea.vmem %s747_s27, 128  ;;  %p749_p3 = scmp.lt.s32.totalorder %s922_s6, %s747_s27 }
  0x22   : > { %p744_p0 = pnand %p742_p13, %p730_p2  ;;  %p750_p11 = scmp.lt.s32.totalorder %s748_s28, %s741_s22 }
  0x24   : > { %p745_p1 = pneg %p744_p0  ;;  %p751_p10 = por %p750_p11, %p749_p3 }
  0x26   : > { %p752_p6 = pnand %p751_p10, %p745_p1 }
  0x28   : > { %755 = shalt.err (!%p752_p6)
}
  0x29   : > { %634 = dma.hbm_to_vmem [thread:$0]  (!%p918_p12), %s914_s4, 64, %s922_s6, %s138_s8  }
  0x2a   : > { %p1045_p4 = scmp.lt.s32.totalorder %s820_s15, 5  ;;  %p1046_p5 = scmp.ge.s32.totalorder %s820_s15, 1 }
  0x2c   : > { %p155_p13 = pnand %p1046_p5, %p1045_p4 }
  0x2d   : > { %s949_s29 = sand.u32 (!%p155_p13), 1, %s812_s13   ;;  %p1047_p6 = scmp.ne.s32.totalorder (!%p155_p13), %s1041_s23, 0 }
  0x2e   : > { %158 = sbr.rel (%p155_p13) target bundleno = 482 (0x1e2), region = 32  ;;  %s605_s30 = sshll.u32 (!%p155_p13), %s949_s29, 2 }
  0x2f   : > { %s161_s5 = scalar_lea.sflag (!%p155_p13), [#allocation3], %s949_s29  ;;  %s953_s9 = scalar_lea.vmem (!%p155_p13), [#allocation2], %s605_s30 }
  0x33   : > { %799 = dma.done.wait (%p1047_p6), %s161_s5, 64  }
  0x34   : > { %801 = vsyncadd (%p1047_p6), %s161_s5, 4294967232  ;;  %v823_v0 = vmov 1   ;;  %v824_v1 = vmov 0   ;;  %v192_v2 = vld [vmem:[%s1036_s2 + $0x18] sm:$0xff]  ;;  %v191_v3 = vld [vmem:[%s1036_s2 + $0x10] sm:$0xff]  ;;  %v825_v6 = vmov 2   ;;  %v218_v12 = vlaneseq }
  0x35   : > { %681 = vset.pattern.permute.xlu0 %v823_v0  ;;  %682 = vset.pattern.permute.xlu1 %v824_v1  ;;  %v190_v4 = vld [vmem:[%s1036_s2 + $0x8] sm:$0xff]  ;;  %v189_v5 = vld [vmem:[%s1036_s2] sm:$0xff]  ;;  %v826_v7 = vmov 0.0   ;;  %v827_v8 = vmov 3   ;;  %v828_v9 = vmov 4   ;;  %v829_v10 = vmov 5  }
  0x36   : > { %249 = vperm.xlu0 %681, %v192_v2   ;;  %209 = vperm.xlu1 %682, %v191_v3   ;;  %v193_v11 = vld [vmem:[%s1036_s2] sm:$0x1]  ;;  %v977_v13 = vshrl.u32 %v218_v12, 7  ;;  %v607_v20 = vld [vmem:[%s953_s9 + $0x1] ss:$2 sm:$0x3] }
  0x37   : > { %408 = vmatprep.mubr.f32.mxu0 %v826_v7  ;;  %420 = vmatprep.mubr.f32.mxu1 %v826_v7  ;;  %v194_v19 = vld [vmem:[%s953_s9] ss:$2 sm:$0x3]  ;;  %vm331_vm0 = vcmask 261120   ;;  %s606_s6 = sshll.u32 %s949_s29, 1  ;;  %s618_s7 = sshll.u32 %s873_s16, 5 }
  0x38   : > { %v220_v16 = vsub.s32 0, %v977_v13  ;;  %v224_v17 = vsub.s32 1, %v977_v13  ;;  %s186_s8 = scalar_lea.vmem [#allocation5], %s606_s6  ;;  %vm510_vm1 = vcmp.lt.s32.totalorder %v218_v12, 256  ;;  %s526_s17 = scalar_lea.hbm %s1037_s3, %s618_s7 }
  0x39   : > { %s528_s10 = sshll.u32 %s186_s8, 4  ;;  %s514_s19 = scalar_lea.sflag [#allocation4], %s949_s29  ;;  %s529_s10 = int_to_ptr.vmem [resolvable:$true] %s528_s10 }
  0x3a   : > { %683 = vset.pattern.permute.xlu1 %v823_v0  ;;  %241 = vperm.xlu0 %681, %v190_v4   ;;  %v221_v22 = vrot.slane %v194_v19, %v220_v16  ;;  %v225_v23 = vrot.slane %v194_v19, %v224_v17  ;;  %v256_v24 = vrot.slane %v607_v20, %v220_v16  ;;  %v314_v16 = vld [vmem:[%s1035_s1 + $0x18] sm:$0xff]  ;;  %s756_s20 = scalar_lea.vmem %s529_s10, 32  ;;  %p1048_p11 = scmp.ne.s32.totalorder %s1042_s24, 0 }
  0x3b   : > { %245 = vperm.xlu1 %683, %v191_v3   ;;  %v260_v25 = vrot.slane %v607_v20, %v224_v17  ;;  %p757_p10 = scmp.ne.s32.totalorder %s529_s10, %s756_s20  ;;  %s831_s22 = smov [#allocation5]  }
  0x3c   : > { %s760_s16 = sshll.u32 %s831_s22, 4  ;;  %s761_s16 = int_to_ptr.vmem [resolvable:$false] %s760_s16 }
  0x3d   : > { %p758_p12 = pnand %p757_p10, %p1048_p11  ;;  %s762_s26 = scalar_lea.vmem %s761_s16, 64 }
  0x3e   : > { %685 = vset.pattern.permute.xlu0 %v824_v1  ;;  %p763_p2 = scmp.lt.s32.totalorder %s529_s10, %s761_s16  ;;  %p764_p7 = scmp.lt.s32.totalorder %s762_s26, %s756_s20 }
  0x3f   : > { %684 = vset.pattern.permute.xlu1 %v824_v1  ;;  %214 = vperm.xlu0 %685, %v192_v2   ;;  %p759_p0 = pneg %p758_p12 }
  0x40   : > { %204 = vperm.xlu1 %684, %v190_v4   ;;  %p765_p8 = por %p764_p7, %p763_p2 }
  0x42   : > { %p766_p9 = pnand %p765_p8, %p759_p0 }
  0x43   : > { %199 = vperm.xlu0 %685, %v189_v5  }
  0x44   : > { %686 = vset.pattern.permute.xlu1 %v825_v6 }
  0x45   : > { %292 = vperm.xlu1 %686, %v192_v2  }
  0x47   : > { %689 = vset.pattern.permute.xlu0 %v825_v6 }
  0x48   : > { %284 = vperm.xlu0 %689, %v190_v4  }
  0x49   : > { %687 = vset.pattern.permute.xlu1 %v823_v0 }
  0x4a   : > { %237 = vperm.xlu1 %687, %v189_v5  }
  0x4c   : > { %691 = vset.pattern.permute.xlu0 %v827_v8 }
  0x4d   : > { %320 = vperm.xlu0 %691, %v190_v4  }
  0x4e   : > { %688 = vset.pattern.permute.xlu1 %v825_v6 }
  0x4f   : > { %288 = vperm.xlu1 %688, %v191_v3  }
  0x51   : > { %692 = vset.pattern.permute.xlu0 %v828_v9 }
  0x52   : > { %442 = vperm.xlu0 %692, %v189_v5  }
  0x53   : > { %280 = vperm.xlu1 %688, %v189_v5  }
  0x56   : > { %454 = vperm.xlu0 %692, %v192_v2  }
  0x57   : > { %690 = vset.pattern.permute.xlu1 %v827_v8 }
  0x58   : > { %316 = vperm.xlu1 %690, %v189_v5  }
  0x5a   : > { %695 = vset.pattern.permute.xlu0 %v829_v10 }
  0x5c   : > { %324 = vperm.xlu1 %690, %v191_v3  }
  0x60   : > { %328 = vperm.xlu1 %690, %v192_v2  }
  0x64   : > { %693 = vset.pattern.permute.xlu1 %v828_v9 }
  0x65   : > { %446 = vperm.xlu1 %693, %v190_v4  }
  0x69   : > { %450 = vperm.xlu1 %693, %v191_v3  }
  0x6d   : > { %694 = vset.pattern.permute.xlu1 %v829_v10 }
  0x6e   : > { %485 = vperm.xlu1 %694, %v193_v11   ;;  %v311_v11 = vld [vmem:[%s1035_s1] sm:$0xff] }
  0xb1   : > { %v210_v14 = vpop.permute.xlu1 %209  ;;  %v250_v15 = vpop.permute.xlu0 %249 }
  0xb2   : > { %v269_v27 = vmul.f32 %v256_v24, %v250_v15  ;;  %v270_v28 = vmul.f32 %v260_v25, %v250_v15  ;;  %v232_v43 = vmul.f32 %v221_v22, %v210_v14  ;;  %v233_v46 = vmul.f32 %v225_v23, %v210_v14  ;;  %v313_v14 = vld [vmem:[%s1035_s1 + $0x10] sm:$0xff]  ;;  %v312_v15 = vld [vmem:[%s1035_s1 + $0x8] sm:$0xff] }
  0xb5   : > { %v242_v18 = vpop.permute.xlu0 %241 }
  0xb6   : > { %v246_v21 = vpop.permute.xlu1 %245  ;;  %v265_v40 = vmul.f32 %v256_v24, %v242_v18  ;;  %v266_v44 = vmul.f32 %v260_v25, %v242_v18 }
  0xb7   : > { %v267_v38 = vmul.f32 %v256_v24, %v246_v21  ;;  %v268_v39 = vmul.f32 %v260_v25, %v246_v21 }
  0xb9   : > { %v275_v48 = vadd.f32 %v267_v38, %v232_v43  ;;  %v276_v52 = vadd.f32 %v268_v39, %v233_v46 }
  0xba   : > { %v215_v26 = vpop.permute.xlu0 %214 }
  0xbb   : > { %v234_v29 = vmul.f32 %v221_v22, %v215_v26  ;;  %v235_v30 = vmul.f32 %v225_v23, %v215_v26  ;;  %v205_v31 = vpop.permute.xlu1 %204 }
  0xbc   : > { %v230_v41 = vmul.f32 %v221_v22, %v205_v31  ;;  %v231_v45 = vmul.f32 %v225_v23, %v205_v31 }
  0xbd   : > { %v277_v32 = vadd.f32 %v269_v27, %v234_v29  ;;  %v278_v33 = vadd.f32 %v270_v28, %v235_v30 }
  0xbe   : > { %v200_v37 = vpop.permute.xlu0 %199  ;;  %v273_v49 = vadd.f32 %v265_v40, %v230_v41  ;;  %v274_v54 = vadd.f32 %v266_v44, %v231_v45 }
  0xbf   : > { %v228_v53 = vmul.f32 %v221_v22, %v200_v37  ;;  %v229_v56 = vmul.f32 %v225_v23, %v200_v37 }
  0xc0   : > { %v293_v34 = vpop.permute.xlu1 %292 }
  0xc1   : > { %v301_v35 = vadd.f32 %v293_v34, %v277_v32  ;;  %v302_v36 = vadd.f32 %v293_v34, %v278_v33 }
  0xc3   : > { %696 = vtanh.f32 %v301_v35  ;;  %v285_v47 = vpop.permute.xlu0 %284 }
  0xc4   : > { %698 = vtanh.f32 %v302_v36  ;;  %v297_v57 = vadd.f32 %v285_v47, %v273_v49  ;;  %v298_v60 = vadd.f32 %v285_v47, %v274_v54 }
  0xc5   : > { %v238_v42 = vpop.permute.xlu1 %237 }
  0xc6   : > { %v263_v50 = vmul.f32 %v256_v24, %v238_v42  ;;  %v264_v51 = vmul.f32 %v260_v25, %v238_v42 }
  0xc8   : > { %v271_v61 = vadd.f32 %v263_v50, %v228_v53  ;;  %v272_v62 = vadd.f32 %v264_v51, %v229_v56  ;;  %v321_v23 = vpop.permute.xlu0 %320 }
  0xca   : > { %v289_v55 = vpop.permute.xlu1 %288 }
  0xcb   : > { %v299_v58 = vadd.f32 %v289_v55, %v275_v48  ;;  %v300_v59 = vadd.f32 %v289_v55, %v276_v52 }
  0xcd   : > { %700 = vtanh.f32 %v299_v58  ;;  %v443_v38 = vpop.permute.xlu0 %442 }
  0xce   : > { %702 = vtanh.f32 %v300_v59  ;;  %v281_v63 = vpop.permute.xlu1 %280 }
  0xcf   : > { %704 = vtanh.f32 %v297_v57  ;;  %v295_v0 = vadd.f32 %v281_v63, %v271_v61  ;;  %v296_v1 = vadd.f32 %v281_v63, %v272_v62 }
  0xd0   : > { %v697_v2 = vpop.eup %696  ;;  %706 = vtanh.f32 %v298_v60 }
  0xd1   : > { %v699_v3 = vpop.eup %698  ;;  %708 = vtanh.f32 %v295_v0  ;;  %v455_v50 = vpop.permute.xlu0 %454 }
  0xd2   : > { %710 = vtanh.f32 %v296_v1  ;;  %368 = vmatprep.subr.mxu0 %v699_v3  ;;  %619 = vmatprep.subr.mxu1 %v699_v3  ;;  %v830_v3 = vmov 1966171168  }
  0xd3   : > { %369 = vmatpush1.msra.mxu0 %v697_v2  ;;  %623 = vmatpush1.msra.mxu1 %v697_v2  ;;  %v317_v17 = vpop.permute.xlu1 %316 }
  0xd7   : > { %v325_v18 = vpop.permute.xlu1 %324 }
  0xda   : > { %v701_v4 = vpop.eup %700 }
  0xdb   : > { %v703_v5 = vpop.eup %702  ;;  %v329_v29 = vpop.permute.xlu1 %328 }
  0xdc   : > { %v705_v6 = vpop.eup %704  ;;  %370 = vmatprep.subr.mxu0 %v703_v5  ;;  %620 = vmatprep.subr.mxu1 %v703_v5 }
  0xdd   : > { %v707_v8 = vpop.eup %706  ;;  %371 = vmatpush1.msra.mxu0 %v701_v4  ;;  %624 = vmatpush1.msra.mxu1 %v701_v4  ;;  %v494_v4 = vunpack.c.l.s4 %v830_v3 }
  0xde   : > { %v709_v9 = vpop.eup %708  ;;  %372 = vmatprep.subr.mxu0 %v707_v8  ;;  %621 = vmatprep.subr.mxu1 %v707_v8 }
  0xdf   : > { %v711_v10 = vpop.eup %710  ;;  %373 = vmatpush1.msra.mxu0 %v705_v6  ;;  %625 = vmatpush1.msra.mxu1 %v705_v6 }
  0xe0   : > { %374 = vmatprep.subr.mxu0 %v711_v10  ;;  %622 = vmatprep.subr.mxu1 %v711_v10  ;;  %v447_v36 = vpop.permute.xlu1 %446  ;;  %v495_v10 = vunpack.c.0.s8 %v494_v4 }
  0xe1   : > { %375 = vmatpush1.msra.mxu0 %v709_v9  ;;  %626 = vmatpush1.msra.mxu1 %v709_v9 }
  0xe2   : > { %608 = vmatmul.mubr.msk.f32.vlgmr.msra.gmra.mxu0 %vm331_vm0, %v311_v11  ;;  %610 = vmatmul.mubr.msk.f32.vlgmr.msra.gmra.mxu1 %vm331_vm0, %v313_v14 }
  0xe3   : > { %414 = vmatprep.mubr.f32.mxu0 %v826_v7  ;;  %426 = vmatprep.mubr.f32.mxu1 %v826_v7 }
  0xe4   : > { %v451_v43 = vpop.permute.xlu1 %450 }
  0xe6   : > { %609 = vmatmul.mubr.msk.f32.gmra.mxu0 %vm331_vm0, %v312_v15  ;;  %611 = vmatmul.mubr.msk.f32.gmra.mxu1 %vm331_vm0, %v314_v16 }
  0xe9   : > { %v486_v14 = vpop.permute.xlu1 %485 }
 0x1a2   : > { %v410_v19 = vpop.f32.mrf.mxu0  ;;  %v422_v20 = vpop.f32.mrf.mxu1 }
 0x1a3   : > { %v411_v21 = vadd.f32 %v410_v19, %v317_v17  ;;  %v423_v22 = vadd.f32 %v422_v20, %v325_v18 }
 0x1a4   : > { %v412_v24 = vpop.f32.mrf.mxu0  ;;  %v424_v25 = vpop.f32.mrf.mxu1 }
 0x1a5   : > { %v413_v7 = vadd.f32 %v412_v24, %v317_v17  ;;  %v425_v26 = vadd.f32 %v424_v25, %v325_v18  ;;  %712 = vtanh.f32 %v411_v21  ;;  %v498_v17 = vsub.s32 %v495_v10, %v977_v13 }
 0x1a6   : > { %v416_v27 = vpop.f32.mrf.mxu0  ;;  %v428_v28 = vpop.f32.mrf.mxu1  ;;  %714 = vtanh.f32 %v423_v22 }
 0x1a7   : > { %v417_v30 = vadd.f32 %v416_v27, %v321_v23  ;;  %716 = vtanh.f32 %v413_v7  ;;  %v429_v31 = vadd.f32 %v428_v28, %v329_v29 }
 0x1a8   : > { %v418_v32 = vpop.f32.mrf.mxu0  ;;  %v430_v33 = vpop.f32.mrf.mxu1  ;;  %718 = vtanh.f32 %v425_v26 }
 0x1a9   : > { %v419_v34 = vadd.f32 %v418_v32, %v321_v23  ;;  %v431_v35 = vadd.f32 %v430_v33, %v329_v29  ;;  %720 = vtanh.f32 %v417_v30 }
 0x1ab   : > { %722 = vtanh.f32 %v419_v34 }
 0x1ac   : > { %724 = vtanh.f32 %v429_v31 }
 0x1ad   : > { %726 = vtanh.f32 %v431_v35 }
 0x1b2   : > { %v713_v37 = vpop.eup %712 }
 0x1b3   : > { %v715_v39 = vpop.eup %714  ;;  %v457_v46 = vmul.f32 %v713_v37, %v443_v38 }
 0x1b4   : > { %v717_v40 = vpop.eup %716  ;;  %v461_v53 = vmul.f32 %v715_v39, %v451_v43 }
 0x1b5   : > { %v719_v41 = vpop.eup %718  ;;  %v458_v49 = vmul.f32 %v717_v40, %v443_v38 }
 0x1b6   : > { %v721_v42 = vpop.eup %720  ;;  %v462_v55 = vmul.f32 %v719_v41, %v451_v43 }
 0x1b7   : > { %v459_v45 = vmul.f32 %v721_v42, %v447_v36 }
 0x1b8   : > { %v723_v44 = vpop.eup %722 }
 0x1b9   : > { %v725_v47 = vpop.eup %724  ;;  %v460_v48 = vmul.f32 %v723_v44, %v447_v36  ;;  %v465_v52 = vadd.f32 %v459_v45, %v457_v46 }
 0x1ba   : > { %v727_v51 = vpop.eup %726  ;;  %v463_v57 = vmul.f32 %v725_v47, %v455_v50 }
 0x1bb   : > { %v474_v54 = vadd.f32 %v460_v48, %v458_v49  ;;  %v466_v56 = vadd.f32 %v465_v52, %v461_v53  ;;  %v464_v59 = vmul.f32 %v727_v51, %v455_v50 }
 0x1bd   : > { %v475_v58 = vadd.f32 %v474_v54, %v462_v55  ;;  %v467_v60 = vadd.f32 %v466_v56, %v463_v57 }
 0x1bf   : > { %v476_v61 = vadd.f32 %v475_v58, %v464_v59  ;;  %v468_v62 = vrot.slane %v467_v60, 4 }
 0x1c1   : > { %v477_v63 = vrot.slane %v476_v61, 4  ;;  %v469_v0 = vadd.f32 %v468_v62, %v467_v60 }
 0x1c3   : > { %v478_v1 = vadd.f32 %v477_v63, %v476_v61  ;;  %v470_v2 = vrot.slane %v469_v0, 2 }
 0x1c5   : > { %v479_v5 = vrot.slane %v478_v1, 2  ;;  %v471_v6 = vadd.f32 %v470_v2, %v469_v0 }
 0x1c7   : > { %v480_v8 = vadd.f32 %v479_v5, %v478_v1  ;;  %v472_v9 = vrot.slane %v471_v6, 1 }
 0x1c9   : > { %v481_v11 = vrot.slane %v480_v8, 1  ;;  %v473_v15 = vadd.f32 %v472_v9, %v471_v6 }
 0x1cb   : > { %v482_v16 = vadd.f32 %v481_v11, %v480_v8  ;;  %v488_v18 = vadd.f32 %v486_v14, %v473_v15 }
 0x1cd   : > { %v489_v19 = vadd.f32 %v486_v14, %v482_v16 }
 0x1cf   : > { %v492_v20 = vcombine.low %v488_v18, %v489_v19 }
 0x1d1   : > { %v499_v21 = vrot.slane %v492_v20, %v498_v17 }
 0x1d3   : > { %v506_v22 = vrot.slane %v499_v21, %v498_v17 }
 0x1d5   : > { %512 = vst.msk [vmem:[%s186_s8] sm:$0x3] %vm510_vm1, %v506_v22 }
 0x1d6   : > { %769 = shalt.err (!%p766_p9)
}
 0x1d7   : > { %s770_s27 = scalar_lea.hbm %s526_s17, 32  ;;  %s774_s30 = scalar_lea.hbm %s1037_s3, 128 }
 0x1d8   : > { %p771_p1 = scmp.ne.s32.totalorder %s526_s17, %s770_s27  ;;  %p775_p5 = scmp.lt.s32.totalorder %s526_s17, %s1037_s3 }
 0x1d9   : > { %p776_p13 = scmp.lt.s32.totalorder %s774_s30, %s770_s27 }
 0x1da   : > { %p772_p3 = pnand %p771_p1, %p1048_p11 }
 0x1db   : > { %p777_p6 = por %p776_p13, %p775_p5 }
 0x1dc   : > { %p773_p4 = pneg %p772_p3 }
 0x1de   : > { %p778_p10 = pnand %p777_p6, %p773_p4 }
 0x1e0   : > { %781 = shalt.err (!%p778_p10)
}
 0x1e1   : > { %629 = dma.vmem_to_hbm [thread:$0]  (%p1048_p11), %s529_s10, 32, %s526_s17, %s514_s19  }
 0x1e2 PF: > { %p640_p12 = scmp.ge.s32.totalorder %s820_s15, 2  ;;  %s540_s4 = sand.u32 1, %s808_s12  }
 0x1e3   : > { %p1049_p0 = scmp.ne.s32.totalorder %s1043_s25, 0  ;;  %s541_s6 = scalar_lea.sflag [#allocation4], %s540_s4 }
 0x1e5   : > { %p636_p2 = pnand %p640_p12, %p1049_p0 }
 0x1e7   : > { %p637_p7 = pneg %p636_p2 }
 0x1e9   : > { %803 = dma.done.wait (%p637_p7), %s541_s6, 32  }
 0x1ea   : > { %805 = vsyncadd (%p637_p7), %s541_s6, 4294967264  ;;  %p16_p8 = scmp.ge.s32.totalorder %s877_s18, 6   ;;  %s1050_s12 = smov %s812_s13 }
 0x1eb   : > { %s1051_s13 = smov %s816_s14  ;;  %s1052_s14 = smov %s889_s21 }
 0x1ec   : > { %s1053_s15 = smov %s877_s18  ;;  %18 = sbr.rel (!%p16_p8) target bundleno = 5 (0x5), region = 78 }
 0x1f1   :  { %546 = vsyncpa [#allocation3], 1 }
 0x1f2   :  { %548 = vsyncpa [#allocation3 + $0x1], 1 }
 0x1f3   :  { %549 = vsyncpa [#allocation4], 1 }
 0x1f4   :  { %551 = vsyncpa [#allocation4 + $0x1], 1 }

</bundles_post_ra>
